<compile_context>
chip_gen: v6e
topology: v6e:2x2x1
jax: 0.10.0
libtpu: 0.0.40
codegen_flags: <defaults>
</compile_context>

<pallas_src>
import jax
import jax.numpy as jnp
from jax import lax
from jax.experimental import pallas as pl
from jax.experimental.pallas import tpu as pltpu


def _attdot_kernel(q_ref, y_ref, att_ref, sim_ref):
    # q_ref: (1, tq, D), y_ref: (1, Tk, D), att_ref: (1, tq, Tk), sim_ref: (1, tq, 1)
    q = q_ref[0]          # (tq, D)
    yb = y_ref[0]         # (Tk, D)

    # att = q @ yb^T  -> (tq, Tk) on the MXU, full-f32 accuracy.
    att = lax.dot_general(
        q, yb,
        dimension_numbers=(((1,), (1,)), ((), ())),
        precision=lax.Precision.HIGHEST,
        preferred_element_type=jnp.float32,
    )
    att_ref[0] = att.astype(att_ref.dtype)

    # Row-wise max over the key axis (single cross-lane reduction).
    sim_ref[0] = jnp.max(att, axis=1, keepdims=True).astype(sim_ref.dtype)


def _pick_tq(Tq, cap=256):
    """Largest power-of-two tile <= cap that divides Tq (full Tq if small/odd)."""
    if Tq <= cap:
        return Tq
    for t in (256, 128, 64, 32, 16, 8):
        if t <= cap and Tq % t == 0:
            return t
    return Tq


def att_dot(query, y, *, tq_cap=256):
    """query: (B, Tq, D), y: (B, Tk, D) -> (att (B, Tq, Tk), sim (B, 1, Tq))."""
    B, Tq, D = query.shape
    B2, Tk, D2 = y.shape
    assert B == B2 and D == D2, "batch / feature dims of query and y must match"

    out_dtype = jnp.promote_types(query.dtype, y.dtype)
    itemsize = jnp.dtype(out_dtype).itemsize

    tq = _pick_tq(Tq, tq_cap)
    nq = Tq // tq

    grid_spec = pltpu.PrefetchScalarGridSpec(
        num_scalar_prefetch=0,
        grid=(B, nq),
        in_specs=[
            # q tile changes with (b, qi)
            pl.BlockSpec((1, tq, D), lambda b, qi: (b, qi, 0)),
            # y block constant across qi -> stays resident, no re-DMA per q tile
            pl.BlockSpec((1, Tk, D), lambda b, qi: (b, 0, 0)),
        ],
        out_specs=[
            pl.BlockSpec((1, tq, Tk), lambda b, qi: (b, qi, 0)),
            pl.BlockSpec((1, tq, 1), lambda b, qi: (b, qi, 0)),
        ],
    )

    # Rough VMEM need: double-buffered q/att/sim tiles + resident y block.
    block_bytes = (tq * D + Tk * D + tq * Tk + tq) * itemsize
    vmem_limit = int(min(64 * 1024 * 1024, max(16 * 1024 * 1024, 6 * block_bytes)))

    cost = pl.CostEstimate(
        flops=2 * B * Tq * Tk * D + B * Tq * Tk,
        transcendentals=0,
        bytes_accessed=itemsize * (B * Tq * D + B * Tk * D + B * Tq * Tk + B * Tq),
    )

    att, sim3 = pl.pallas_call(
        _attdot_kernel,
        out_shape=(
            jax.ShapeDtypeStruct((B, Tq, Tk), out_dtype),
            jax.ShapeDtypeStruct((B, Tq, 1), out_dtype),
        ),
        grid_spec=grid_spec,
        compiler_params=pltpu.CompilerParams(
            dimension_semantics=("parallel", "parallel"),
            vmem_limit_bytes=vmem_limit,
        ),
        cost_estimate=cost,
    )(query, y)

    # (B, Tq, 1) -> (B, 1, Tq): size-1 dim collapse, metadata-only reshape.
    sim = sim3.reshape(B, 1, Tq)
    return att, sim


def _reference(query, y):
    att = jnp.einsum("bqd,bkd->bqk", query, y, precision=lax.Precision.HIGHEST)
    sim = jnp.max(att, axis=2)[:, None, :]
    return att, sim


if __name__ == "__main__":
    key = jax.random.PRNGKey(0)
    k1, k2, k3, k4 = jax.random.split(key, 4)

    # Small shapes consistent with the module: batch=2, seq_q=8, seq_k=16, hidden=32.
    B, Tq, Tk, D = 2, 8, 16, 32
    q = jax.random.normal(k1, (B, Tq, D), dtype=jnp.float32)
    yv = jax.random.normal(k2, (B, Tk, D), dtype=jnp.float32)

    att, sim = jax.block_until_ready(att_dot(q, yv))
    att_r, sim_r = _reference(q, yv)
    assert att.shape == (B, Tq, Tk) and sim.shape == (B, 1, Tq)
    assert jnp.allclose(att, att_r, atol=1e-5, rtol=1e-5), "att mismatch vs reference"
    assert jnp.allclose(sim, sim_r, atol=1e-5, rtol=1e-5), "sim mismatch vs reference"

    # Larger case that exercises the Tq tile axis (grid=(2, 2)) with y resident.
    B, Tq, Tk, D = 2, 512, 128, 64
    q = jax.random.normal(k3, (B, Tq, D), dtype=jnp.float32)
    yv = jax.random.normal(k4, (B, Tk, D), dtype=jnp.float32)

    att, sim = jax.block_until_ready(att_dot(q, yv))
    att_r, sim_r = _reference(q, yv)
    assert att.shape == (B, Tq, Tk) and sim.shape == (B, 1, Tq)
    assert jnp.allclose(att, att_r, atol=1e-4, rtol=1e-4), "att mismatch vs reference"
    assert jnp.allclose(sim, sim_r, atol=1e-4, rtol=1e-4), "sim mismatch vs reference"

    print("KERNEL_OK")
</pallas_src>

<mosaic_0001>
module attributes {stable_mosaic.version = 11 : i64} {
  func.func @_attdot_kernel(%arg0: i32, %arg1: i32, %arg2: memref<1x8x32xf32, #tpu.memory_space<vmem>>, %arg3: memref<1x16x32xf32, #tpu.memory_space<vmem>>, %arg4: memref<1x8x16xf32, #tpu.memory_space<vmem>>, %arg5: memref<1x8x1xf32, #tpu.memory_space<vmem>>) attributes {dimension_semantics = [#tpu.dimension_semantics<parallel>, #tpu.dimension_semantics<parallel>], iteration_bounds = array<i64: 2, 1>, scalar_prefetch = 0 : i64, scratch_operands = 0 : i64, tpu.core_type = #tpu.core_type<tc>, window_params = [{transform_indices = @transform_0, window_bounds = array<i64: 1, 8, 32>}, {transform_indices = @transform_1, window_bounds = array<i64: 1, 16, 32>}, {transform_indices = @transform_2, window_bounds = array<i64: 1, 8, 16>}, {transform_indices = @transform_3, window_bounds = array<i64: 1, 8, 1>}]} {
    %c0 = arith.constant 0 : index
    %c0_0 = arith.constant 0 : index
    %c0_1 = arith.constant 0 : index
    %0 = vector.load %arg2[%c0, %c0_0, %c0_1] : memref<1x8x32xf32, #tpu.memory_space<vmem>>, vector<1x8x32xf32>
    %1 = vector.shape_cast %0 : vector<1x8x32xf32> to vector<8x32xf32>
    %c0_2 = arith.constant 0 : index
    %c0_3 = arith.constant 0 : index
    %c0_4 = arith.constant 0 : index
    %2 = vector.load %arg3[%c0_2, %c0_3, %c0_4] : memref<1x16x32xf32, #tpu.memory_space<vmem>>, vector<1x16x32xf32>
    %3 = vector.shape_cast %2 : vector<1x16x32xf32> to vector<16x32xf32>
    %cst = arith.constant dense<0.000000e+00> : vector<8x16xf32>
    %4 = tpu.matmul %1, %3, %cst {dimension_numbers = #tpu.dot_dimension_numbers<[1], [1], [0], [0], [0, 0, 1, 0], [], []>, precision = #tpu.contract_precision<fp32>} : vector<8x32xf32>, vector<16x32xf32>, vector<8x16xf32> -> vector<8x16xf32>
    %c0_5 = arith.constant 0 : index
    %c0_6 = arith.constant 0 : index
    %c0_7 = arith.constant 0 : index
    %5 = vector.load %arg4[%c0_5, %c0_6, %c0_7] : memref<1x8x16xf32, #tpu.memory_space<vmem>>, vector<1x8x16xf32>
    %6 = vector.shape_cast %5 : vector<1x8x16xf32> to vector<8x16xf32>
    %7 = vector.shape_cast %4 : vector<8x16xf32> to vector<1x8x16xf32>
    tpu.vector_store %arg4[%c0_5, %c0_6, %c0_7], %7 {strides = array<i32>} : memref<1x8x16xf32, #tpu.memory_space<vmem>>, vector<1x8x16xf32>,
    %cst_8 = arith.constant dense<0xFF800000> : vector<8xf32>
    %8 = vector.multi_reduction <maximumf>, %4, %cst_8 [1] : vector<8x16xf32> to vector<8xf32>
    %9 = vector.shape_cast %8 : vector<8xf32> to vector<8x1xf32>
    %c0_9 = arith.constant 0 : index
    %c0_10 = arith.constant 0 : index
    %c0_11 = arith.constant 0 : index
    %10 = vector.load %arg5[%c0_9, %c0_10, %c0_11] : memref<1x8x1xf32, #tpu.memory_space<vmem>>, vector<1x8x1xf32>
    %11 = vector.shape_cast %10 : vector<1x8x1xf32> to vector<8x1xf32>
    %12 = vector.shape_cast %9 : vector<8x1xf32> to vector<1x8x1xf32>
    tpu.vector_store %arg5[%c0_9, %c0_10, %c0_11], %12 {strides = array<i32>} : memref<1x8x1xf32, #tpu.memory_space<vmem>>, vector<1x8x1xf32>,
    return
  }
  func.func @transform_0(%arg0: i32, %arg1: i32) -> (i32, i32, i32) {
    %c0_i32 = arith.constant 0 : i32
    %c0_i32_0 = arith.constant 0 : i32
    return %arg0, %arg1, %c0_i32 : i32, i32, i32
  }
  func.func @transform_1(%arg0: i32, %arg1: i32) -> (i32, i32, i32) {
    %c0_i32 = arith.constant 0 : i32
    %c0_i32_0 = arith.constant 0 : i32
    %c0_i32_1 = arith.constant 0 : i32
    return %arg0, %c0_i32, %c0_i32_0 : i32, i32, i32
  }
  func.func @transform_2(%arg0: i32, %arg1: i32) -> (i32, i32, i32) {
    %c0_i32 = arith.constant 0 : i32
    %c0_i32_0 = arith.constant 0 : i32
    return %arg0, %arg1, %c0_i32 : i32, i32, i32
  }
  func.func @transform_3(%arg0: i32, %arg1: i32) -> (i32, i32, i32) {
    %c0_i32 = arith.constant 0 : i32
    %c0_i32_0 = arith.constant 0 : i32
    return %arg0, %arg1, %c0_i32 : i32, i32, i32
  }
}

</mosaic_0001>

<bundles_post_ra>
// kernel: tpu_custom_call.1
= control target key start
LH: loop header
LB: loop body
LE: loop exit
PB: predicated region body
PF: predicated region fallthrough
CT: control target
= control target key end

     0   :  { %9 = vsyncpa [#allocation3], 0  ;;  %s1398_s0 = inlined_call_operand.hbm [shape: f32[2,8,32], index: 0, kind: input, shape index: {}]   ;;  %s1399_s1 = inlined_call_operand.hbm [shape: f32[2,16,32], index: 1, kind: input, shape index: {}]   ;;  %s1400_s2 = inlined_call_operand.hbm [shape: f32[2,8,16], index: 2, kind: output, shape index: {0}]   ;;  %s1401_s3 = inlined_call_operand.vmem [shape: f32[2,8,1], index: 3, kind: output, shape index: {1}]  }
   0x1   :  { %11 = vsyncpa [#allocation3 + $0x1], 0 }
   0x2   :  { %12 = vsyncpa [#allocation6], 0 }
   0x3   :  { %14 = vsyncpa [#allocation6 + $0x1], 0 }
   0x4   :  { %15 = vsyncpa [#allocation4], 0 }
   0x5   :  { %17 = vsyncpa [#allocation4 + $0x1], 0  ;;  %s1219_s12 = smov 0   ;;  %s1221_s13 = smov 0  }
   0x6   :  { %s1223_s14 = smov 0   ;;  %s1225_s15 = smov 0  }
   0x7   :  { %s1227_s16 = smov 0   ;;  %s1229_s17 = smov 0  }
   0x8 LB: > { %s900_s18 = sadd.s32 4294967295, %s1190_s17   ;;  %s901_s19 = sadd.s32 4294967294, %s1190_s17   ;;  %s1190_s17 = sphi %s1229_s17, %s23_s17   ;;  %s1186_s16 = sphi %s1227_s16, %s1413_s16   ;;  %s1182_s15 = sphi %s1225_s15, %s1412_s15   ;;  %s1178_s14 = sphi %s1223_s14, %s1411_s14   ;;  %s1174_s13 = sphi %s1221_s13, %s1410_s13   ;;  %s1170_s12 = sphi %s1219_s12, %s1409_s12  }
   0x9   : > { %s35_s20 = sadd.s32 1, %s1186_s16  ;;  %s44_s21 = sadd.s32 1, %s1178_s14 }
   0xa   : > { %p37_p0 = scmp.ge.s32.totalorder %s35_s20, 2  ;;  %p51_p1 = scmp.ne.s32.totalorder %s1178_s14, %s1174_s13 }
   0xb   : > { %p52_p2 = scmp.eq.s32.totalorder %s1190_s17, 0  ;;  %p57_p3 = scmp.ne.s32.totalorder %s1174_s13, %s1170_s12 }
   0xc   : > { %s1415_s20 = smov (%p37_p0, %s35_s20), 0  ;;  %p58_p5 = scmp.eq.s32.totalorder %s900_s18, 0 }
   0xd   : > { %p1260_p4 = por %p52_p2, %p51_p1  ;;  %s39_s23 = ssub.s32 %s1186_s16, %s1415_s20 }
   0xe   : > { %p109_p6 = scmp.eq.s32.totalorder %s900_s18, 1  ;;  %p42_p7 = scmp.eq.s32.totalorder %s39_s23, 0 }
   0xf   : > { %p1266_p8 = por %p58_p5, %p57_p3  ;;  %p115_p10 = scmp.eq.s32.totalorder %s901_s19, 1 }
  0x10   : > { %p1270_p9 = por %p109_p6, %p51_p1  ;;  %p996_p13 = scmp.lt.s32.totalorder %s1190_s17, 2 }
  0x11   : > { %s1275_s26 = scalar_select %p42_p7, %s1178_s14, %s44_s21  }
  0x12   : > { %p1277_p11 = por %p115_p10, %p57_p3  ;;  %s1284_s28 = sand.u32 1, %s1178_s14  }
  0x13   : > { %s904_s29 = sshll.u32 %s1284_s28, 3  ;;  %s905_s30 = sshll.u32 %s1186_s16, 7 }
  0x14   : > { %s173_s6 = scalar_lea.hbm %s1398_s0, %s905_s30  ;;  %s167_s7 = scalar_lea.vmem [#allocation2], %s904_s29 }
  0x15   : > { %s175_s8 = sshll.u32 %s167_s7, 4  ;;  %p1293_p0 = pnand %p996_p13, %p1260_p4  ;;  %s176_s8 = int_to_ptr.vmem [resolvable:$true] %s175_s8 }
  0x16   : > { %p909_p1 = scmp.ge.s32.totalorder %s1190_s17, 1  ;;  %p201_p2 = scmp.lt.s32.totalorder %s1190_s17, 3 }
  0x17   : > { %s164_s10 = scalar_lea.sflag [#allocation3], %s1284_s28  ;;  %p1052_p3 = pneg %p1293_p0 }
  0x18   : > { %s1063_s11 = scalar_lea.vmem %s176_s8, 128  ;;  %s1192_s18 = smov [#allocation2]  }
  0x19   : > { %p1064_p5 = scmp.ne.s32.totalorder %s176_s8, %s1063_s11  ;;  %s1068_s19 = sshll.u32 %s1192_s18, 4  ;;  %s1069_s19 = int_to_ptr.vmem [resolvable:$false] %s1068_s19 }
  0x1a   : > { %s1070_s21 = scalar_lea.vmem %s1069_s19, 256  ;;  %p1071_p4 = scmp.lt.s32.totalorder %s176_s8, %s1069_s19 }
  0x1b   : > { %p1066_p6 = pnand %p1064_p5, %p1052_p3  ;;  %p1072_p10 = scmp.lt.s32.totalorder %s1070_s21, %s1063_s11 }
  0x1d   : > { %p1067_p7 = pneg %p1066_p6  ;;  %p1073_p13 = por %p1072_p10, %p1071_p4 }
  0x1f   : > { %p1074_p12 = pnand %p1073_p13, %p1067_p7 }
  0x21   : > { %1077 = shalt.err (!%p1074_p12)
}
  0x22   : > { %988 = dma.hbm_to_vmem [thread:$0]  (!%p1293_p0), %s173_s6, 128, %s176_s8, %s164_s10  }
  0x23   : > { %p1311_p5 = pnand %p909_p1, %p201_p2  ;;  %s906_s23 = sshll.u32 %s1284_s28, 4 }
  0x24   : > { %s918_s29 = sshll.u32 %s1186_s16, 8  ;;  %s186_s7 = scalar_lea.vmem [#allocation5], %s906_s23 }
  0x25   : > { %s192_s5 = scalar_lea.hbm %s1399_s1, %s918_s29  ;;  %s193_s11 = sshll.u32 %s186_s7, 4  ;;  %s194_s11 = int_to_ptr.vmem [resolvable:$true] %s193_s11 }
  0x26   : > { %s183_s18 = scalar_lea.sflag [#allocation6], %s1284_s28  ;;  %s1091_s19 = scalar_lea.vmem %s194_s11, 256 }
  0x27   : > { %p1092_p12 = scmp.ne.s32.totalorder %s194_s11, %s1091_s19  ;;  %s1193_s6 = smov [#allocation5]  }
  0x28   : > { %s1096_s8 = sshll.u32 %s1193_s6, 4  ;;  %s1097_s8 = int_to_ptr.vmem [resolvable:$false] %s1096_s8 }
  0x29   : > { %p1094_p6 = pnand %p1092_p12, %p1052_p3  ;;  %s1098_s10 = scalar_lea.vmem %s1097_s8, 512 }
  0x2a   : > { %p1099_p1 = scmp.lt.s32.totalorder %s194_s11, %s1097_s8  ;;  %p1100_p2 = scmp.lt.s32.totalorder %s1098_s10, %s1091_s19 }
  0x2b   : > { %p1095_p7 = pneg %p1094_p6 }
  0x2c   : > { %p1101_p4 = por %p1100_p2, %p1099_p1 }
  0x2e   : > { %p1102_p10 = pnand %p1101_p4, %p1095_p7 }
  0x30   : > { %1105 = shalt.err (!%p1102_p10)
}
  0x31   : > { %s1194_s21 = smov 128   ;;  %s1195_s23 = smov 8  }
  0x32   : > { %991 = dma.hbm_to_vmem [thread:$0]  (!%p1293_p0), %s192_s5, 256, %s194_s11, %s183_s18, %s1194_s21, %s1194_s21, %s1195_s23  }
  0x33   : > { %205 = sbr.rel (%p1311_p5) target bundleno = 430 (0x1ae), region = 28  ;;  %s1329_s28 = sand.u32 (!%p1311_p5), 1, %s1174_s13  }
  0x34   : > { %s910_s29 = sshll.u32 (!%p1311_p5), %s1329_s28, 3  ;;  %s208_s30 = scalar_lea.sflag (!%p1311_p5), [#allocation3], %s1329_s28 }
  0x35   : > { %s211_s4 = scalar_lea.vmem (!%p1311_p5), [#allocation2], %s910_s29 }
  0x38   : > { %1157 = dma.done.wait (%p1266_p8), %s208_s30, 128  }
  0x39   : > { %1159 = vsyncadd (%p1266_p8), %s208_s30, 4294967168  ;;  %s911_s9 = sshll.u32 %s1329_s28, 4  ;;  %s217_s22 = scalar_lea.sflag [#allocation6], %s1329_s28 }
  0x3a   : > { %s220_s5 = scalar_lea.vmem [#allocation5], %s911_s9 }
  0x3b   : > { %1161 = dma.done.wait (%p1266_p8), %s217_s22, 256  }
  0x3c   : > { %1163 = vsyncadd (%p1266_p8), %s217_s22, 4294967040  ;;  %v1196_v0 = vmov 0.0   ;;  %vm1197_vm0 = vmmov 0   ;;  %vm265_vm1 = vcmask 261120   ;;  %v264_v1 = vld [vmem:[%s220_s5 + $0x8] sm:$0xff]  ;;  %v263_v2 = vld [vmem:[%s220_s5] sm:$0xff] }
  0x3d   : > { %937 = vmatprep.subr.mxu0 %v1196_v0  ;;  %944 = vmatprep.subr.mxu1 %v1196_v0  ;;  %v262_v3 = vld [vmem:[%s211_s4] sm:$0xff]  ;;  %v273_v4 = vsel %vm265_vm1, %v264_v1, 0  ;;  %v270_v5 = vsel %vm265_vm1, %v263_v2, 0  ;;  %vm734_vm2 = vcmask 130048   ;;  %s245_s24 = scalar_lea.vmem [#allocation7], %s910_s29  ;;  %s915_s7 = sshll.u32 %s1182_s15, 7 }
  0x3e   : > { %941 = vmatprep.mubr.msk.f32.mxu0 %vm1197_vm0, %v1196_v0  ;;  %948 = vmatprep.mubr.msk.f32.mxu1 %vm1197_vm0, %v1196_v0  ;;  %v267_v6 = vsel %vm265_vm1, %v262_v3, 0  ;;  %v304_v7 = vand.u32 4294901760, %v273_v4  ;;  %v307_v8 = vand.u32 4294901760, %v270_v5  ;;  %s763_s11 = sshll.u32 %s245_s24, 4  ;;  %s761_s6 = scalar_lea.hbm %s1400_s2, %s915_s7  ;;  %s764_s11 = int_to_ptr.vmem [resolvable:$true] %s763_s11 }
  0x3f   : > { %v342_v9 = vand.u32 4294901760, %v267_v6  ;;  %s742_s8 = scalar_lea.sflag [#allocation4], %s1329_s28  ;;  %s1106_s10 = scalar_lea.vmem %s764_s11, 128 }
  0x40   : > { %938 = vmatpush3.xpose.msra.mxu0 %v304_v7  ;;  %v382_v10 = vsub.f32 %v273_v4, %v304_v7  ;;  %v389_v12 = vsub.f32 %v270_v5, %v307_v8  ;;  %p1107_p8 = scmp.ne.s32.totalorder %s764_s11, %s1106_s10  ;;  %s1198_s21 = smov [#allocation7]  }
  0x41   : > { %v343_v11 = vsub.f32 %v267_v6, %v342_v9  ;;  %939 = vmatprep.subr.mxu0 %v1196_v0  ;;  %s1110_s23 = sshll.u32 %s1198_s21, 4  ;;  %s1111_s23 = int_to_ptr.vmem [resolvable:$false] %s1110_s23 }
  0x42   : > { %v383_v13 = vand.u32 4294901760, %v382_v10  ;;  %v390_v15 = vand.u32 4294901760, %v389_v12  ;;  %p1108_p0 = pnand %p1107_p8, %p1270_p9  ;;  %s1112_s29 = scalar_lea.vmem %s1111_s23, 256 }
  0x43   : > { %v344_v14 = vand.u32 4294901760, %v343_v11  ;;  %p1113_p13 = scmp.lt.s32.totalorder %s764_s11, %s1111_s23  ;;  %p1114_p5 = scmp.lt.s32.totalorder %s1112_s29, %s1106_s10 }
  0x44   : > { %940 = vmatpush3.xpose.msra.mxu0 %v307_v8  ;;  %v384_v16 = vsub.f32 %v382_v10, %v383_v13  ;;  %v391_v18 = vsub.f32 %v389_v12, %v390_v15  ;;  %p1109_p3 = pneg %p1108_p0 }
  0x45   : > { %v345_v17 = vsub.f32 %v343_v11, %v344_v14  ;;  %951 = vmatprep.subr.mxu0 %v1196_v0  ;;  %p1115_p12 = por %p1114_p5, %p1113_p13 }
  0x46   : > { %v385_v19 = vand.u32 4294901760, %v384_v16  ;;  %v392_v21 = vand.u32 4294901760, %v391_v18 }
  0x47   : > { %v346_v20 = vand.u32 4294901760, %v345_v17  ;;  %p1116_p6 = pnand %p1115_p12, %p1109_p3 }
  0x48   : > { %945 = vmatpush3.xpose.msra.mxu1 %v385_v19 }
  0x49   : > { %942 = vmatmul.mubr.f32.vlgmr.msra.gmra.mxu0 %v346_v20  ;;  %946 = vmatprep.subr.mxu1 %v1196_v0 }
  0x4a   : > { %952 = vmatpush3.xpose.msra.mxu0 %v382_v10  ;;  %955 = vmatprep.mubr.msk.f32.mxu0 %vm1197_vm0, %v1196_v0 }
  0x4b   : > { %953 = vmatprep.subr.mxu0 %v1196_v0 }
  0x4c   : > { %947 = vmatpush3.xpose.msra.mxu1 %v392_v21 }
  0x4d   : > { %958 = vmatprep.subr.mxu1 %v1196_v0 }
  0x4e   : > { %954 = vmatpush3.xpose.msra.mxu0 %v389_v12 }
  0x4f   : > { %965 = vmatprep.subr.mxu0 %v1196_v0  ;;  %949 = vmatmul.mubr.f32.vlgmr.msra.gmra.mxu1 %v342_v9 }
  0x50   : > { %959 = vmatpush3.xpose.msra.mxu1 %v304_v7  ;;  %962 = vmatprep.mubr.msk.f32.mxu1 %vm1197_vm0, %v1196_v0 }
  0x51   : > { %956 = vmatmul.mubr.f32.vlgmr.msra.gmra.mxu0 %v343_v11  ;;  %960 = vmatprep.subr.mxu1 %v1196_v0 }
  0x52   : > { %966 = vmatpush3.xpose.msra.mxu0 %v383_v13  ;;  %969 = vmatprep.mubr.msk.f32.mxu0 %vm1197_vm0, %v1196_v0 }
  0x53   : > { %967 = vmatprep.subr.mxu0 %v1196_v0 }
  0x54   : > { %961 = vmatpush3.xpose.msra.mxu1 %v307_v8 }
  0x55   : > { %972 = vmatprep.subr.mxu1 %v1196_v0 }
  0x56   : > { %968 = vmatpush3.xpose.msra.mxu0 %v390_v15 }
  0x57   : > { %963 = vmatmul.mubr.f32.vlgmr.msra.gmra.mxu1 %v344_v14 }
  0x58   : > { %973 = vmatpush3.xpose.msra.mxu1 %v304_v7  ;;  %976 = vmatprep.mubr.msk.f32.mxu1 %vm1197_vm0, %v1196_v0 }
  0x59   : > { %970 = vmatmul.mubr.f32.vlgmr.msra.gmra.mxu0 %v342_v9  ;;  %974 = vmatprep.subr.mxu1 %v1196_v0 }
  0x5c   : > { %975 = vmatpush3.xpose.msra.mxu1 %v307_v8 }
  0x5f   : > { %977 = vmatmul.mubr.f32.vlgmr.msra.gmra.mxu1 %v342_v9 }
 0x109   : > { %v348_v22 = vpop.f32.mrf.mxu0 }
 0x10b   : > { %v943_v23 = vpop.f32.mrf.mxu0 }
 0x10f   : > { %v429_v24 = vpop.f32.mrf.mxu1 }
 0x110   : > { %v430_v28 = vadd.f32 %v429_v24, %v348_v22 }
 0x111   : > { %v505_v25 = vpop.f32.mrf.mxu0  ;;  %v950_v26 = vpop.f32.mrf.mxu1 }
 0x112   : > { %v506_v30 = vadd.f32 %v505_v25, %v430_v28 }
 0x113   : > { %v957_v27 = vpop.f32.mrf.mxu0 }
 0x117   : > { %v580_v29 = vpop.f32.mrf.mxu1 }
 0x118   : > { %v581_v33 = vadd.f32 %v580_v29, %v506_v30 }
 0x119   : > { %v657_v31 = vpop.f32.mrf.mxu0  ;;  %v964_v32 = vpop.f32.mrf.mxu1 }
 0x11a   : > { %v658_v35 = vadd.f32 %v657_v31, %v581_v33 }
 0x11b   : > { %v971_v34 = vpop.f32.mrf.mxu0 }
 0x11f   : > { %v730_v36 = vpop.f32.mrf.mxu1 }
 0x120   : > { %v731_v37 = vadd.f32 %v730_v36, %v658_v35 }
 0x121   : > { %v978_v38 = vpop.f32.mrf.mxu1 }
 0x122   : > { %735 = vst.msk [vmem:[%s245_s24] sm:$0xff] %vm734_vm2, %v731_v37  ;;  %v736_v39 = vsel %vm734_vm2, %v731_v37, -inf }
 0x123   : > { %737 = vmax.xlane.f32.xlu0 %v736_v39 }
 0x124   : > { %1119 = shalt.err (!%p1116_p6)
}
 0x125   : > { %s1120_s30 = scalar_lea.hbm %s761_s6, 128  ;;  %s1124_s9 = scalar_lea.hbm %s1400_s2, 256 }
 0x126   : > { %p1121_p7 = scmp.ne.s32.totalorder %s761_s6, %s1120_s30  ;;  %p1125_p4 = scmp.lt.s32.totalorder %s761_s6, %s1400_s2 }
 0x127   : > { %p1126_p10 = scmp.lt.s32.totalorder %s1124_s9, %s1120_s30 }
 0x128   : > { %p1122_p1 = pnand %p1121_p7, %p1270_p9 }
 0x129   : > { %p1127_p8 = por %p1126_p10, %p1125_p4 }
 0x12a   : > { %p1123_p2 = pneg %p1122_p1 }
 0x12c   : > { %p1128_p0 = pnand %p1127_p8, %p1123_p2 }
 0x12e   : > { %1131 = shalt.err (!%p1128_p0)
}
 0x12f   : > { %983 = dma.vmem_to_hbm [thread:$0]  (%p1270_p9), %s764_s11, 128, %s761_s6, %s742_s8   ;;  %vm739_vm3 = vcmask 7168  }
 0x130   : > { %p255_p3 = scmp.lt.s32.totalorder %s1182_s15, 1 }
 0x132   : > { %s1417_s15 = smov (!%p255_p3, %s1182_s15), 1 }
 0x133   : > { %s913_s24 = sshll.u32 %s1417_s15, 3 }
 0x134   : > { %s261_s19 = scalar_lea.vmem %s1401_s3, %s913_s24 }
 0x1ac   : > { %v738_v40 = vpop.xlane.xlu0 %737 }
 0x1ad   : > { %740 = vst.msk [vmem:[%s261_s19] sm:$0xff] %vm739_vm3, %v738_v40 }
 0x1ae PF: > { %s778_s10 = sand.u32 1, %s1170_s12   ;;  %p1408_p13 = scmp.ge.s32.totalorder %s1190_s17, 2 }
 0x1af   : > { %s779_s25 = scalar_lea.sflag [#allocation4], %s778_s10 }
 0x1b0   : > { %p993_p5 = pnand %p1408_p13, %p1277_p11 }
 0x1b2   : > { %p994_p12 = pneg %p993_p5 }
 0x1b4   : > { %1165 = dma.done.wait (%p994_p12), %s779_s25, 128  }
 0x1b5   : > { %1167 = vsyncadd (%p994_p12), %s779_s25, 4294967168  ;;  %s23_s17 = sadd.s32 1, %s1190_s17   ;;  %s1409_s12 = smov %s1174_s13 }
 0x1b6   : > { %p20_p9 = scmp.ge.s32.totalorder %s23_s17, 4   ;;  %s1410_s13 = smov %s1178_s14 }
 0x1b7   : > { %s1411_s14 = smov %s1275_s26  ;;  %s1412_s15 = smov %s1186_s16 }
 0x1b8   : > { %s1413_s16 = smov %s1415_s20  ;;  %22 = sbr.rel (!%p20_p9) target bundleno = 8 (0x8), region = 98 }
 0x1bd   :  { %794 = vsyncpa [#allocation3], 1 }
 0x1be   :  { %796 = vsyncpa [#allocation3 + $0x1], 1 }
 0x1bf   :  { %797 = vsyncpa [#allocation6], 1 }
 0x1c0   :  { %799 = vsyncpa [#allocation6 + $0x1], 1 }
 0x1c1   :  { %800 = vsyncpa [#allocation4], 1 }
 0x1c2   :  { %802 = vsyncpa [#allocation4 + $0x1], 1 }

</bundles_post_ra>
